<compile_context>
chip_gen: v7x
topology: tpu7x:2x2x1
jax: 0.10.0
libtpu: 0.0.40
codegen_flags: <defaults>
</compile_context>

<pallas_src>
import functools

import jax
import jax.numpy as jnp
from jax.experimental import pallas as pl
from jax.experimental.pallas import tpu as pltpu

SMALL = 1e-12        # psim epsilon (matches the module)
LARGE = 1e9          # diagonal mask value (matches the module)
BN_EPS = 1e-5        # nn.BatchNorm1d default eps
ZINV_CLAMP = 1e30    # guard: softmax underflow -> 1/z would be inf


# =============================================================================
# Kernel 1: batch-resident prep (projection / BN / softmax + row normalization)
# =============================================================================
def _prep_kernel(a_ref, b_ref, w1_ref, p1_ref, w2_ref, p2_ref,
                 xn_ref, z_ref, zinv_ref, *, bsz):
    n = 2 * bsz
    a = a_ref[...]                       # (B, D) f32
    b = b_ref[...]                       # (B, D) f32

    # stack both views straight into the xn output buffer (reused as scratch;
    # no extra (N, D) VMEM copy and no HBM concat round trip)
    xn_ref[0:bsz, :] = a
    xn_ref[bsz:n, :] = b
    x = xn_ref[...]                      # (N, D)

    # ---- SimCSE operand: pre-normalized rows (cos-sim == xn @ xn.T) ----------
    inv_norm = 1.0 / jnp.sqrt(jnp.sum(x * x, axis=1, keepdims=True) + SMALL)
    xn_ref[...] = x * inv_norm

    # ---- projection MLP on the stacked batch (one MXU pass per Linear) -------
    w1 = w1_ref[...]
    b1, g1, be1 = p1_ref[0:1, :], p1_ref[1:2, :], p1_ref[2:3, :]
    w2 = w2_ref[...]
    b2, g2, be2 = p2_ref[0:1, :], p2_ref[1:2, :], p2_ref[2:3, :]

    # per-view (train-mode, biased) BatchNorm via masked reductions on the
    # stacked batch: keeps one big matmul while preserving per-view statistics.
    view_a = jax.lax.broadcasted_iota(jnp.int32, (n, 1), 0) < bsz
    inv_b = 1.0 / bsz

    def bn_per_view(h, g, be):
        ha = jnp.where(view_a, h, 0.0)
        hb = h - ha
        m = jnp.where(view_a,
                      jnp.sum(ha, axis=0, keepdims=True),
                      jnp.sum(hb, axis=0, keepdims=True)) * inv_b
        d = h - m
        d2 = d * d
        d2a = jnp.where(view_a, d2, 0.0)
        v = jnp.where(view_a,
                      jnp.sum(d2a, axis=0, keepdims=True),
                      jnp.sum(d2 - d2a, axis=0, keepdims=True)) * inv_b
        return d * (g / jnp.sqrt(v + BN_EPS)) + be

    h = jnp.dot(x, w1, preferred_element_type=jnp.float32) + b1
    h = jnp.maximum(bn_per_view(h, g1, be1), 0.0)          # BN -> ReLU
    zl = jnp.dot(h, w2, preferred_element_type=jnp.float32) + b2
    zl = bn_per_view(zl, g2, be2)

    # ---- softmax(dim=1); z and 1/z share one exp + one row-sum ----------------
    mx = jnp.max(zl, axis=1, keepdims=True)
    ez = jnp.exp(zl - mx)
    se = jnp.sum(ez, axis=1, keepdims=True)
    z_ref[...] = ez * (1.0 / se)
    # 1/z = se/ez (one reciprocal pass), clamped against softmax underflow
    zinv_ref[...] = jnp.minimum(se * (1.0 / jnp.maximum(ez, 1e-37)), ZINV_CLAMP)


# =============================================================================
# Kernel 2: tiled flash-style cross-entropy over both N x N similarity matrices
# =============================================================================
def _loss_kernel(xnq_ref, xnk_ref, zq_ref, zk_ref, ziq_ref, zik_ref,
                 out_ref, m1, s1, t1, m2, s2, t2, *,
                 inv_st, inv_ht, w_sim, w_hil, bsz, tq, tk):
    qi = pl.program_id(0)
    kj = pl.program_id(1)
    last_k = pl.num_programs(1) - 1

    # ---- init per-row-block online-softmax stats at the first column block ----
    @pl.when(kj == 0)
    def _():
        m1[...] = jnp.full_like(m1, -jnp.inf)
        s1[...] = jnp.zeros_like(s1)
        t1[...] = jnp.zeros_like(t1)
        m2[...] = jnp.full_like(m2, -jnp.inf)
        s2[...] = jnp.zeros_like(s2)
        t2[...] = jnp.zeros_like(t2)

    # per-tile global row/column indices (regenerated each tile, never kept live)
    grow = qi * tq + jax.lax.broadcasted_iota(jnp.int32, (tq, tk), 0)
    gcol = kj * tk + jax.lax.broadcasted_iota(jnp.int32, (tq, tk), 1)
    diag = grow == gcol                  # only non-empty when qi == kj

    # ---- SimCSE tile: xn_q @ xn_k^T / temp, diagonal masked to -LARGE ---------
    sim = jax.lax.dot_general(xnq_ref[...], xnk_ref[...],
                              (((1,), (1,)), ((), ())),
                              preferred_element_type=jnp.float32) * inv_st
    sim = jnp.where(diag, -LARGE, sim)

    # ---- Hilbert tile: funk[i,j]*funk[j,i] without a full funk matrix ---------
    #   funk[i,j]       = z_i . (1/z_j)   -> z_q    @ zinv_k^T
    #   funk[j,i] (^T)  = (1/z_i) . z_j   -> zinv_q @ z_k^T   (already transposed,
    #                      no second full N x N x E pass, no XLU transpose needed)
    f_qk = jax.lax.dot_general(zq_ref[...], zik_ref[...],
                               (((1,), (1,)), ((), ())),
                               preferred_element_type=jnp.float32)
    f_kq_t = jax.lax.dot_general(ziq_ref[...], zk_ref[...],
                                 (((1,), (1,)), ((), ())),
                                 preferred_element_type=jnp.float32)
    prod = f_qk * f_kq_t                 # strictly positive off-diagonal
    hil = 1.0 / (jnp.log(jnp.maximum(prod, 1e-37)) * inv_ht + 1.0)
    hil = jnp.where(diag, -LARGE, hil)

    # ---- online max / sum-exp update (flash-style) ----------------------------
    def online(m_ref, s_ref, logits):
        m_prev = m_ref[...]
        m_new = jnp.maximum(m_prev, jnp.max(logits, axis=1, keepdims=True))
        s_ref[...] = (s_ref[...] * jnp.exp(m_prev - m_new)
                      + jnp.sum(jnp.exp(logits - m_new), axis=1, keepdims=True))
        m_ref[...] = m_new

    online(m1, s1, sim)
    online(m2, s2, hil)

    # ---- target logits: only one column block per row block can hold the
    #      SimCSE labels (i -> i +/- bsz), so gate the masked sum on it ---------
    half_blocks = bsz // tq              # static; tq divides bsz and tq == tk
    tgt_blk = jnp.where(qi < half_blocks, qi + half_blocks, qi - half_blocks)

    @pl.when(kj == tgt_blk)
    def _():
        tgt_col = jnp.where(grow < bsz, grow + bsz, grow - bsz)
        tmask = gcol == tgt_col
        t1[...] += jnp.sum(jnp.where(tmask, sim, 0.0), axis=1, keepdims=True)
        t2[...] += jnp.sum(jnp.where(tmask, hil, 0.0), axis=1, keepdims=True)

    # ---- finalize: per-row-block partial CE sums (already weighted) -----------
    @pl.when(kj == last_k)
    def _():
        l_sim = jnp.sum(m1[...] + jnp.log(s1[...]) - t1[...]) * w_sim
        l_hil = jnp.sum(m2[...] + jnp.log(s2[...]) - t2[...]) * w_hil
        slot = jax.lax.broadcasted_iota(jnp.int32, (1, 8, 128), 1)
        out_ref[...] = jnp.where(slot == 0, l_sim,
                                 jnp.where(slot == 1, l_hil, 0.0))


# =============================================================================
# Wrapper
# =============================================================================
def _pick_tile(bsz):
    """Largest multiple-of-8 divisor of bsz, capped at 256 (MXU/VPU friendly)."""
    t, c = 8, 8
    while c <= min(bsz, 256):
        if bsz % c == 0:
            t = c
        c += 8
    return t


def _round_up(x, m):
    return (x + m - 1) // m * m


def _vmem_limit(nbytes):
    """Explicit scoped-VMEM limit: >= default, kept below v7x's 64 MiB/core."""
    return int(min(max(nbytes + (8 << 20), 32 << 20), 48 << 20))


def simcse_hilbert_loss(emb_a, emb_b, params, simcse_temp, hilbert_temp, lam):
    assert emb_a.shape == emb_b.shape, "the two views must share batch/dim"
    w1t, b1, g1, be1, w2t, b2, g2, be2 = params
    bsz, d = emb_a.shape
    e = w2t.shape[1]
    n = 2 * bsz
    # TODO(synk): pad the batch when bsz is not a multiple of 8 (sublane tiling).
    assert bsz % 8 == 0, "batch per view must be a multiple of 8"

    tile = _pick_tile(bsz)               # tq == tk; divides bsz so the label
    nb = n // tile                       # column block is unique per row block
    f32 = 4

    # pack the small per-feature vectors (bias, BN gamma, BN beta): 2 DMAs not 6
    p1 = jnp.concatenate([b1, g1, be1], axis=0)          # (3, D)
    p2 = jnp.concatenate([b2, g2, be2], axis=0)          # (3, E)

    # ---------------- kernel 1: prep (batch-resident, O(N*D)) -----------------
    prep_bytes = f32 * (
        2 * bsz * _round_up(d, 128)                       # emb_a / emb_b
        + d * _round_up(d, 128) + d * _round_up(e, 128)   # w1, w2
        + 3 * (_round_up(d, 128) + _round_up(e, 128))     # packed params
        + n * _round_up(d, 128) + 2 * n * _round_up(e, 128)   # outputs
        + 4 * n * _round_up(d, 128))                      # live intermediates
    prep_args = (emb_a, emb_b, w1t, p1, w2t, p2)
    xn, z, zinv = pl.pallas_call(
        functools.partial(_prep_kernel, bsz=bsz),
        out_shape=(jax.ShapeDtypeStruct((n, d), jnp.float32),
                   jax.ShapeDtypeStruct((n, e), jnp.float32),
                   jax.ShapeDtypeStruct((n, e), jnp.float32)),
        grid=(1,),
        in_specs=[pl.BlockSpec(x.shape, lambda i: (0, 0)) for x in prep_args],
        out_specs=(pl.BlockSpec((n, d), lambda i: (0, 0)),
                   pl.BlockSpec((n, e), lambda i: (0, 0)),
                   pl.BlockSpec((n, e), lambda i: (0, 0))),
        compiler_params=pltpu.CompilerParams(
            dimension_semantics=("arbitrary",),
            vmem_limit_bytes=_vmem_limit(prep_bytes)),
    )(*prep_args)

    # ------------- kernel 2: tiled loss (grid over row/col blocks) ------------
    loss_bytes = f32 * (
        2 * 2 * tile * _round_up(d, 128)                  # xn_q / xn_k (double-buffered)
        + 2 * 4 * tile * _round_up(e, 128)                # z / zinv tiles (double-buffered)
        + 8 * tile * _round_up(tile, 128)                 # live per-tile temporaries
        + 6 * tile * 128                                  # online-softmax scratch
        + 2 * 8 * 128)                                    # partial-loss output block
    kern = functools.partial(
        _loss_kernel,
        inv_st=float(1.0 / simcse_temp),
        inv_ht=float(1.0 / hilbert_temp),
        w_sim=float(lam) / float(n),
        w_hil=1.0 / float(n),
        bsz=bsz, tq=tile, tk=tile)
    partials = pl.pallas_call(
        kern,
        out_shape=jax.ShapeDtypeStruct((nb, 8, 128), jnp.float32),
        grid=(nb, nb),
        in_specs=[
            pl.BlockSpec((tile, d), lambda qi, kj: (qi, 0)),   # xn_q
            pl.BlockSpec((tile, d), lambda qi, kj: (kj, 0)),   # xn_k
            pl.BlockSpec((tile, e), lambda qi, kj: (qi, 0)),   # z_q
            pl.BlockSpec((tile, e), lambda qi, kj: (kj, 0)),   # z_k
            pl.BlockSpec((tile, e), lambda qi, kj: (qi, 0)),   # zinv_q
            pl.BlockSpec((tile, e), lambda qi, kj: (kj, 0)),   # zinv_k
        ],
        out_specs=pl.BlockSpec((1, 8, 128), lambda qi, kj: (qi, 0, 0)),
        scratch_shapes=[pltpu.VMEM((tile, 1), jnp.float32)] * 6,
        compiler_params=pltpu.CompilerParams(
            dimension_semantics=("parallel", "arbitrary"),
            vmem_limit_bytes=_vmem_limit(loss_bytes)),
    )(xn, xn, z, z, zinv, zinv)

    # tiny final reduction over per-row-block partials (weighted in-kernel)
    return jnp.sum(partials[:, 0, 0]) + jnp.sum(partials[:, 1, 0])


# ---------------------------------------------------------------------------
# Pure-JAX reference (same math, no Pallas) for a correctness check
# ---------------------------------------------------------------------------
def _reference(emb_a, emb_b, params, st, ht, lam):
    w1t, b1, g1, be1, w2t, b2, g2, be2 = params

    def proj(a):
        h = a @ w1t + b1
        m = h.mean(0, keepdims=True)
        v = ((h - m) ** 2).mean(0, keepdims=True)
        h = (h - m) / jnp.sqrt(v + BN_EPS) * g1 + be1
        h = jnp.maximum(h, 0.0)
        zz = h @ w2t + b2
        m2 = zz.mean(0, keepdims=True)
        v2 = ((zz - m2) ** 2).mean(0, keepdims=True)
        zz = (zz - m2) / jnp.sqrt(v2 + BN_EPS) * g2 + be2
        return jax.nn.softmax(zz, axis=1)

    x = jnp.concatenate([emb_a, emb_b], 0)
    n = x.shape[0]
    half = n // 2
    labels = jnp.concatenate([jnp.arange(half, n), jnp.arange(half)])

    def ce(logits):
        ls = jax.nn.log_softmax(logits, axis=1)
        return -jnp.mean(ls[jnp.arange(n), labels])

    norm = jnp.sqrt((x ** 2).sum(1) + SMALL)
    sim = (x @ x.T) / (norm[:, None] * norm[None, :]) / st - LARGE * jnp.eye(n)
    l1 = lam * ce(sim)

    zc = jnp.concatenate([proj(emb_a), proj(emb_b)], 0)
    funk = zc @ (1.0 / zc).T
    offdiag = ~jnp.eye(n, dtype=bool)
    logd = jnp.log(jnp.where(offdiag, funk * funk.T, 1.0)) / ht
    sim2 = jnp.where(offdiag, 1.0 / (logd + 1.0), 0.0) - LARGE * jnp.eye(n)
    l2 = ce(sim2)
    return l1 + l2


if __name__ == "__main__":
    # small, module-consistent shapes: batch=8 per view, sentence dim=32, proj dim=16
    B, D, E = 8, 32, 16
    SIMCSE_TEMP = 0.05
    HILBERT_TEMP = 1.0
    LAMBDA = 0.1

    key = jax.random.PRNGKey(0)
    ks = jax.random.split(key, 10)
    emb_a = jax.random.normal(ks[0], (B, D), jnp.float32)
    emb_b = jax.random.normal(ks[1], (B, D), jnp.float32)

    # deterministic synthetic projection parameters (Linear weights pre-transposed)
    w1t = jax.random.normal(ks[2], (D, D), jnp.float32) * 0.1
    b1 = jax.random.normal(ks[3], (1, D), jnp.float32) * 0.05
    g1 = 1.0 + jax.random.normal(ks[4], (1, D), jnp.float32) * 0.05
    be1 = jax.random.normal(ks[5], (1, D), jnp.float32) * 0.05
    w2t = jax.random.normal(ks[6], (D, E), jnp.float32) * 0.1
    b2 = jax.random.normal(ks[7], (1, E), jnp.float32) * 0.05
    g2 = 1.0 + jax.random.normal(ks[8], (1, E), jnp.float32) * 0.05
    be2 = jax.random.normal(ks[9], (1, E), jnp.float32) * 0.05
    params = (w1t, b1, g1, be1, w2t, b2, g2, be2)

    loss = simcse_hilbert_loss(emb_a, emb_b, params, SIMCSE_TEMP, HILBERT_TEMP, LAMBDA)
    loss = jax.block_until_ready(loss)

    ref = jax.block_until_ready(
        _reference(emb_a, emb_b, params, SIMCSE_TEMP, HILBERT_TEMP, LAMBDA))

    assert jnp.isfinite(loss), f"non-finite loss: {loss}"
    assert abs(float(loss) - float(ref)) <= 1e-3 * max(1.0, abs(float(ref))), \
        f"mismatch: pallas={float(loss)} ref={float(ref)}"
    print("KERNEL_OK")
</pallas_src>

<mosaic_0001>
module attributes {stable_mosaic.version = 11 : i64} {
  func.func @_prep_kernel(%arg0: i32, %arg1: memref<8x32xf32, #tpu.memory_space<vmem>>, %arg2: memref<8x32xf32, #tpu.memory_space<vmem>>, %arg3: memref<32x32xf32, #tpu.memory_space<vmem>>, %arg4: memref<3x32xf32, #tpu.memory_space<vmem>>, %arg5: memref<32x16xf32, #tpu.memory_space<vmem>>, %arg6: memref<3x16xf32, #tpu.memory_space<vmem>>, %arg7: memref<16x32xf32, #tpu.memory_space<vmem>>, %arg8: memref<16x16xf32, #tpu.memory_space<vmem>>, %arg9: memref<16x16xf32, #tpu.memory_space<vmem>>) attributes {dimension_semantics = [#tpu.dimension_semantics<arbitrary>], iteration_bounds = array<i64: 1>, scalar_prefetch = 0 : i64, scratch_operands = 0 : i64, tpu.core_type = #tpu.core_type<tc>, window_params = [{pipeline_mode = #tpu.pipeline_mode<synchronous>, transform_indices = @transform_0, window_bounds = array<i64: 8, 32>}, {pipeline_mode = #tpu.pipeline_mode<synchronous>, transform_indices = @transform_1, window_bounds = array<i64: 8, 32>}, {pipeline_mode = #tpu.pipeline_mode<synchronous>, transform_indices = @transform_2, window_bounds = array<i64: 32, 32>}, {pipeline_mode = #tpu.pipeline_mode<synchronous>, transform_indices = @transform_3, window_bounds = array<i64: 3, 32>}, {pipeline_mode = #tpu.pipeline_mode<synchronous>, transform_indices = @transform_4, window_bounds = array<i64: 32, 16>}, {pipeline_mode = #tpu.pipeline_mode<synchronous>, transform_indices = @transform_5, window_bounds = array<i64: 3, 16>}, {pipeline_mode = #tpu.pipeline_mode<synchronous>, transform_indices = @transform_6, window_bounds = array<i64: 16, 32>}, {pipeline_mode = #tpu.pipeline_mode<synchronous>, transform_indices = @transform_7, window_bounds = array<i64: 16, 16>}, {pipeline_mode = #tpu.pipeline_mode<synchronous>, transform_indices = @transform_8, window_bounds = array<i64: 16, 16>}]} {
    %c0 = arith.constant 0 : index
    %c0_0 = arith.constant 0 : index
    %0 = vector.load %arg1[%c0, %c0_0] : memref<8x32xf32, #tpu.memory_space<vmem>>, vector<8x32xf32>
    %c0_1 = arith.constant 0 : index
    %c0_2 = arith.constant 0 : index
    %1 = vector.load %arg2[%c0_1, %c0_2] : memref<8x32xf32, #tpu.memory_space<vmem>>, vector<8x32xf32>
    %c0_3 = arith.constant 0 : index
    %c0_4 = arith.constant 0 : index
    %2 = vector.load %arg7[%c0_3, %c0_4] : memref<16x32xf32, #tpu.memory_space<vmem>>, vector<8x32xf32>
    tpu.vector_store %arg7[%c0_3, %c0_4], %0 {strides = array<i32>} : memref<16x32xf32, #tpu.memory_space<vmem>>, vector<8x32xf32>,
    %c8 = arith.constant 8 : index
    %c0_5 = arith.constant 0 : index
    %3 = vector.load %arg7[%c8, %c0_5] : memref<16x32xf32, #tpu.memory_space<vmem>>, vector<8x32xf32>
    tpu.vector_store %arg7[%c8, %c0_5], %1 {strides = array<i32>} : memref<16x32xf32, #tpu.memory_space<vmem>>, vector<8x32xf32>,
    %c0_6 = arith.constant 0 : index
    %c0_7 = arith.constant 0 : index
    %4 = vector.load %arg7[%c0_6, %c0_7] : memref<16x32xf32, #tpu.memory_space<vmem>>, vector<16x32xf32>
    %5 = arith.mulf %4, %4 : vector<16x32xf32>
    %cst = arith.constant dense<0.000000e+00> : vector<16xf32>
    %6 = vector.multi_reduction <add>, %5, %cst [1] : vector<16x32xf32> to vector<16xf32>
    %7 = vector.shape_cast %6 : vector<16xf32> to vector<16x1xf32>
    %cst_8 = arith.constant 9.99999996E-13 : f32
    %8 = vector.broadcast %cst_8 : f32 to vector<16x1xf32>
    %9 = arith.addf %7, %8 : vector<16x1xf32>
    %10 = math.sqrt %9 : vector<16x1xf32>
    %cst_9 = arith.constant 1.000000e+00 : f32
    %11 = vector.broadcast %cst_9 : f32 to vector<16x1xf32>
    %12 = arith.divf %11, %10 : vector<16x1xf32>
    %13 = vector.broadcast %12 : vector<16x1xf32> to vector<16x32xf32>
    %14 = arith.mulf %4, %13 : vector<16x32xf32>
    %c0_10 = arith.constant 0 : index
    %c0_11 = arith.constant 0 : index
    %15 = vector.load %arg7[%c0_10, %c0_11] : memref<16x32xf32, #tpu.memory_space<vmem>>, vector<16x32xf32>
    tpu.vector_store %arg7[%c0_10, %c0_11], %14 {strides = array<i32>} : memref<16x32xf32, #tpu.memory_space<vmem>>, vector<16x32xf32>,
    %c0_12 = arith.constant 0 : index
    %c0_13 = arith.constant 0 : index
    %16 = vector.load %arg3[%c0_12, %c0_13] : memref<32x32xf32, #tpu.memory_space<vmem>>, vector<32x32xf32>
    %c0_14 = arith.constant 0 : index
    %c0_15 = arith.constant 0 : index
    %17 = vector.load %arg4[%c0_14, %c0_15] : memref<3x32xf32, #tpu.memory_space<vmem>>, vector<1x32xf32>
    %c1 = arith.constant 1 : index
    %c0_16 = arith.constant 0 : index
    %18 = vector.load %arg4[%c1, %c0_16] : memref<3x32xf32, #tpu.memory_space<vmem>>, vector<1x32xf32>
    %c2 = arith.constant 2 : index
    %c0_17 = arith.constant 0 : index
    %19 = vector.load %arg4[%c2, %c0_17] : memref<3x32xf32, #tpu.memory_space<vmem>>, vector<1x32xf32>
    %c0_18 = arith.constant 0 : index
    %c0_19 = arith.constant 0 : index
    %20 = vector.load %arg5[%c0_18, %c0_19] : memref<32x16xf32, #tpu.memory_space<vmem>>, vector<32x16xf32>
    %c0_20 = arith.constant 0 : index
    %c0_21 = arith.constant 0 : index
    %21 = vector.load %arg6[%c0_20, %c0_21] : memref<3x16xf32, #tpu.memory_space<vmem>>, vector<1x16xf32>
    %c1_22 = arith.constant 1 : index
    %c0_23 = arith.constant 0 : index
    %22 = vector.load %arg6[%c1_22, %c0_23] : memref<3x16xf32, #tpu.memory_space<vmem>>, vector<1x16xf32>
    %c2_24 = arith.constant 2 : index
    %c0_25 = arith.constant 0 : index
    %23 = vector.load %arg6[%c2_24, %c0_25] : memref<3x16xf32, #tpu.memory_space<vmem>>, vector<1x16xf32>
    %24 = tpu.iota {dimensions = array<i32: 0>} : vector<16x1xi32>
    %c8_i32 = arith.constant 8 : i32
    %25 = vector.broadcast %c8_i32 : i32 to vector<16x1xi32>
    %26 = arith.cmpi slt, %24, %25 : vector<16x1xi32>
    %cst_26 = arith.constant dense<0.000000e+00> : vector<16x32xf32>
    %27 = tpu.matmul %4, %16, %cst_26 {dimension_numbers = #tpu.dot_dimension_numbers<[1], [0], [0], [1], [0, 0, 1, 1], [], []>} : vector<16x32xf32>, vector<32x32xf32>, vector<16x32xf32> -> vector<16x32xf32>
    %28 = vector.broadcast %17 : vector<1x32xf32> to vector<16x32xf32>
    %29 = arith.addf %27, %28 : vector<16x32xf32>
    %cst_27 = arith.constant 0.000000e+00 : f32
    %30 = vector.shape_cast %26 : vector<16x1xi1> to vector<16x1xi1>
    %31 = vector.broadcast %30 : vector<16x1xi1> to vector<16x32xi1>
    %32 = vector.broadcast %cst_27 : f32 to vector<16x32xf32>
    %33 = arith.select %31, %29, %32 : vector<16x32xi1>, vector<16x32xf32>
    %34 = arith.subf %29, %33 : vector<16x32xf32>
    %cst_28 = arith.constant dense<0.000000e+00> : vector<32xf32>
    %35 = vector.multi_reduction <add>, %33, %cst_28 [0] : vector<16x32xf32> to vector<32xf32>
    %36 = vector.shape_cast %35 : vector<32xf32> to vector<1x32xf32>
    %cst_29 = arith.constant dense<0.000000e+00> : vector<32xf32>
    %37 = vector.multi_reduction <add>, %34, %cst_29 [0] : vector<16x32xf32> to vector<32xf32>
    %38 = vector.shape_cast %37 : vector<32xf32> to vector<1x32xf32>
    %39 = vector.shape_cast %26 : vector<16x1xi1> to vector<16x1xi1>
    %40 = vector.broadcast %39 : vector<16x1xi1> to vector<16x32xi1>
    %41 = vector.shape_cast %36 : vector<1x32xf32> to vector<1x32xf32>
    %42 = vector.broadcast %41 : vector<1x32xf32> to vector<16x32xf32>
    %43 = vector.shape_cast %38 : vector<1x32xf32> to vector<1x32xf32>
    %44 = vector.broadcast %43 : vector<1x32xf32> to vector<16x32xf32>
    %45 = arith.select %40, %42, %44 : vector<16x32xi1>, vector<16x32xf32>
    %cst_30 = arith.constant 1.250000e-01 : f32
    %46 = vector.broadcast %cst_30 : f32 to vector<16x32xf32>
    %47 = arith.mulf %45, %46 : vector<16x32xf32>
    %48 = arith.subf %29, %47 : vector<16x32xf32>
    %49 = arith.mulf %48, %48 : vector<16x32xf32>
    %cst_31 = arith.constant 0.000000e+00 : f32
    %50 = vector.shape_cast %26 : vector<16x1xi1> to vector<16x1xi1>
    %51 = vector.broadcast %50 : vector<16x1xi1> to vector<16x32xi1>
    %52 = vector.broadcast %cst_31 : f32 to vector<16x32xf32>
    %53 = arith.select %51, %49, %52 : vector<16x32xi1>, vector<16x32xf32>
    %cst_32 = arith.constant dense<0.000000e+00> : vector<32xf32>
    %54 = vector.multi_reduction <add>, %53, %cst_32 [0] : vector<16x32xf32> to vector<32xf32>
    %55 = vector.shape_cast %54 : vector<32xf32> to vector<1x32xf32>
    %56 = arith.subf %49, %53 : vector<16x32xf32>
    %cst_33 = arith.constant dense<0.000000e+00> : vector<32xf32>
    %57 = vector.multi_reduction <add>, %56, %cst_33 [0] : vector<16x32xf32> to vector<32xf32>
    %58 = vector.shape_cast %57 : vector<32xf32> to vector<1x32xf32>
    %59 = vector.shape_cast %26 : vector<16x1xi1> to vector<16x1xi1>
    %60 = vector.broadcast %59 : vector<16x1xi1> to vector<16x32xi1>
    %61 = vector.shape_cast %55 : vector<1x32xf32> to vector<1x32xf32>
    %62 = vector.broadcast %61 : vector<1x32xf32> to vector<16x32xf32>
    %63 = vector.shape_cast %58 : vector<1x32xf32> to vector<1x32xf32>
    %64 = vector.broadcast %63 : vector<1x32xf32> to vector<16x32xf32>
    %65 = arith.select %60, %62, %64 : vector<16x32xi1>, vector<16x32xf32>
    %cst_34 = arith.constant 1.250000e-01 : f32
    %66 = vector.broadcast %cst_34 : f32 to vector<16x32xf32>
    %67 = arith.mulf %65, %66 : vector<16x32xf32>
    %cst_35 = arith.constant 9.99999974E-6 : f32
    %68 = vector.broadcast %cst_35 : f32 to vector<16x32xf32>
    %69 = arith.addf %67, %68 : vector<16x32xf32>
    %70 = math.sqrt %69 : vector<16x32xf32>
    %71 = vector.broadcast %18 : vector<1x32xf32> to vector<16x32xf32>
    %72 = arith.divf %71, %70 : vector<16x32xf32>
    %73 = arith.mulf %48, %72 : vector<16x32xf32>
    %74 = vector.broadcast %19 : vector<1x32xf32> to vector<16x32xf32>
    %75 = arith.addf %73, %74 : vector<16x32xf32>
    %cst_36 = arith.constant 0.000000e+00 : f32
    %76 = vector.broadcast %cst_36 : f32 to vector<16x32xf32>
    %77 = arith.maximumf %75, %76 : vector<16x32xf32>
    %cst_37 = arith.constant dense<0.000000e+00> : vector<16x16xf32>
    %78 = tpu.matmul %77, %20, %cst_37 {dimension_numbers = #tpu.dot_dimension_numbers<[1], [0], [0], [1], [0, 0, 1, 1], [], []>} : vector<16x32xf32>, vector<32x16xf32>, vector<16x16xf32> -> vector<16x16xf32>
    %79 = vector.broadcast %21 : vector<1x16xf32> to vector<16x16xf32>
    %80 = arith.addf %78, %79 : vector<16x16xf32>
    %cst_38 = arith.constant 0.000000e+00 : f32
    %81 = vector.shape_cast %26 : vector<16x1xi1> to vector<16x1xi1>
    %82 = vector.broadcast %81 : vector<16x1xi1> to vector<16x16xi1>
    %83 = vector.broadcast %cst_38 : f32 to vector<16x16xf32>
    %84 = arith.select %82, %80, %83 : vector<16x16xi1>, vector<16x16xf32>
    %85 = arith.subf %80, %84 : vector<16x16xf32>
    %cst_39 = arith.constant dense<0.000000e+00> : vector<16xf32>
    %86 = vector.multi_reduction <add>, %84, %cst_39 [0] : vector<16x16xf32> to vector<16xf32>
    %87 = vector.shape_cast %86 : vector<16xf32> to vector<1x16xf32>
    %cst_40 = arith.constant dense<0.000000e+00> : vector<16xf32>
    %88 = vector.multi_reduction <add>, %85, %cst_40 [0] : vector<16x16xf32> to vector<16xf32>
    %89 = vector.shape_cast %88 : vector<16xf32> to vector<1x16xf32>
    %90 = vector.shape_cast %26 : vector<16x1xi1> to vector<16x1xi1>
    %91 = vector.broadcast %90 : vector<16x1xi1> to vector<16x16xi1>
    %92 = vector.shape_cast %87 : vector<1x16xf32> to vector<1x16xf32>
    %93 = vector.broadcast %92 : vector<1x16xf32> to vector<16x16xf32>
    %94 = vector.shape_cast %89 : vector<1x16xf32> to vector<1x16xf32>
    %95 = vector.broadcast %94 : vector<1x16xf32> to vector<16x16xf32>
    %96 = arith.select %91, %93, %95 : vector<16x16xi1>, vector<16x16xf32>
    %cst_41 = arith.constant 1.250000e-01 : f32
    %97 = vector.broadcast %cst_41 : f32 to vector<16x16xf32>
    %98 = arith.mulf %96, %97 : vector<16x16xf32>
    %99 = arith.subf %80, %98 : vector<16x16xf32>
    %100 = arith.mulf %99, %99 : vector<16x16xf32>
    %cst_42 = arith.constant 0.000000e+00 : f32
    %101 = vector.shape_cast %26 : vector<16x1xi1> to vector<16x1xi1>
    %102 = vector.broadcast %101 : vector<16x1xi1> to vector<16x16xi1>
    %103 = vector.broadcast %cst_42 : f32 to vector<16x16xf32>
    %104 = arith.select %102, %100, %103 : vector<16x16xi1>, vector<16x16xf32>
    %cst_43 = arith.constant dense<0.000000e+00> : vector<16xf32>
    %105 = vector.multi_reduction <add>, %104, %cst_43 [0] : vector<16x16xf32> to vector<16xf32>
    %106 = vector.shape_cast %105 : vector<16xf32> to vector<1x16xf32>
    %107 = arith.subf %100, %104 : vector<16x16xf32>
    %cst_44 = arith.constant dense<0.000000e+00> : vector<16xf32>
    %108 = vector.multi_reduction <add>, %107, %cst_44 [0] : vector<16x16xf32> to vector<16xf32>
    %109 = vector.shape_cast %108 : vector<16xf32> to vector<1x16xf32>
    %110 = vector.shape_cast %26 : vector<16x1xi1> to vector<16x1xi1>
    %111 = vector.broadcast %110 : vector<16x1xi1> to vector<16x16xi1>
    %112 = vector.shape_cast %106 : vector<1x16xf32> to vector<1x16xf32>
    %113 = vector.broadcast %112 : vector<1x16xf32> to vector<16x16xf32>
    %114 = vector.shape_cast %109 : vector<1x16xf32> to vector<1x16xf32>
    %115 = vector.broadcast %114 : vector<1x16xf32> to vector<16x16xf32>
    %116 = arith.select %111, %113, %115 : vector<16x16xi1>, vector<16x16xf32>
    %cst_45 = arith.constant 1.250000e-01 : f32
    %117 = vector.broadcast %cst_45 : f32 to vector<16x16xf32>
    %118 = arith.mulf %116, %117 : vector<16x16xf32>
    %cst_46 = arith.constant 9.99999974E-6 : f32
    %119 = vector.broadcast %cst_46 : f32 to vector<16x16xf32>
    %120 = arith.addf %118, %119 : vector<16x16xf32>
    %121 = math.sqrt %120 : vector<16x16xf32>
    %122 = vector.broadcast %22 : vector<1x16xf32> to vector<16x16xf32>
    %123 = arith.divf %122, %121 : vector<16x16xf32>
    %124 = arith.mulf %99, %123 : vector<16x16xf32>
    %125 = vector.broadcast %23 : vector<1x16xf32> to vector<16x16xf32>
    %126 = arith.addf %124, %125 : vector<16x16xf32>
    %cst_47 = arith.constant dense<0xFF800000> : vector<16xf32>
    %127 = vector.multi_reduction <maximumf>, %126, %cst_47 [1] : vector<16x16xf32> to vector<16xf32>
    %128 = vector.shape_cast %127 : vector<16xf32> to vector<16x1xf32>
    %129 = vector.broadcast %128 : vector<16x1xf32> to vector<16x16xf32>
    %130 = arith.subf %126, %129 : vector<16x16xf32>
    %131 = math.exp %130 : vector<16x16xf32>
    %cst_48 = arith.constant dense<0.000000e+00> : vector<16xf32>
    %132 = vector.multi_reduction <add>, %131, %cst_48 [1] : vector<16x16xf32> to vector<16xf32>
    %133 = vector.shape_cast %132 : vector<16xf32> to vector<16x1xf32>
    %cst_49 = arith.constant 1.000000e+00 : f32
    %134 = vector.broadcast %cst_49 : f32 to vector<16x1xf32>
    %135 = arith.divf %134, %133 : vector<16x1xf32>
    %136 = vector.broadcast %135 : vector<16x1xf32> to vector<16x16xf32>
    %137 = arith.mulf %131, %136 : vector<16x16xf32>
    %c0_50 = arith.constant 0 : index
    %c0_51 = arith.constant 0 : index
    %138 = vector.load %arg8[%c0_50, %c0_51] : memref<16x16xf32, #tpu.memory_space<vmem>>, vector<16x16xf32>
    tpu.vector_store %arg8[%c0_50, %c0_51], %137 {strides = array<i32>} : memref<16x16xf32, #tpu.memory_space<vmem>>, vector<16x16xf32>,
    %cst_52 = arith.constant 9.99999991E-38 : f32
    %139 = vector.broadcast %cst_52 : f32 to vector<16x16xf32>
    %140 = arith.maximumf %131, %139 : vector<16x16xf32>
    %cst_53 = arith.constant 1.000000e+00 : f32
    %141 = vector.broadcast %cst_53 : f32 to vector<16x16xf32>
    %142 = arith.divf %141, %140 : vector<16x16xf32>
    %143 = vector.broadcast %133 : vector<16x1xf32> to vector<16x16xf32>
    %144 = arith.mulf %143, %142 : vector<16x16xf32>
    %cst_54 = arith.constant 1.000000e+30 : f32
    %145 = vector.broadcast %cst_54 : f32 to vector<16x16xf32>
    %146 = arith.minimumf %144, %145 : vector<16x16xf32>
    %c0_55 = arith.constant 0 : index
    %c0_56 = arith.constant 0 : index
    %147 = vector.load %arg9[%c0_55, %c0_56] : memref<16x16xf32, #tpu.memory_space<vmem>>, vector<16x16xf32>
    tpu.vector_store %arg9[%c0_55, %c0_56], %146 {strides = array<i32>} : memref<16x16xf32, #tpu.memory_space<vmem>>, vector<16x16xf32>,
    return
  }
  func.func @transform_0(%arg0: i32) -> (i32, i32) {
    %c0_i32 = arith.constant 0 : i32
    %c0_i32_0 = arith.constant 0 : i32
    %c0_i32_1 = arith.constant 0 : i32
    return %c0_i32, %c0_i32_0 : i32, i32
  }
  func.func @transform_1(%arg0: i32) -> (i32, i32) {
    %c0_i32 = arith.constant 0 : i32
    %c0_i32_0 = arith.constant 0 : i32
    %c0_i32_1 = arith.constant 0 : i32
    return %c0_i32, %c0_i32_0 : i32, i32
  }
  func.func @transform_2(%arg0: i32) -> (i32, i32) {
    %c0_i32 = arith.constant 0 : i32
    %c0_i32_0 = arith.constant 0 : i32
    %c0_i32_1 = arith.constant 0 : i32
    return %c0_i32, %c0_i32_0 : i32, i32
  }
  func.func @transform_3(%arg0: i32) -> (i32, i32) {
    %c0_i32 = arith.constant 0 : i32
    %c0_i32_0 = arith.constant 0 : i32
    %c0_i32_1 = arith.constant 0 : i32
    return %c0_i32, %c0_i32_0 : i32, i32
  }
  func.func @transform_4(%arg0: i32) -> (i32, i32) {
    %c0_i32 = arith.constant 0 : i32
    %c0_i32_0 = arith.constant 0 : i32
    %c0_i32_1 = arith.constant 0 : i32
    return %c0_i32, %c0_i32_0 : i32, i32
  }
  func.func @transform_5(%arg0: i32) -> (i32, i32) {
    %c0_i32 = arith.constant 0 : i32
    %c0_i32_0 = arith.constant 0 : i32
    %c0_i32_1 = arith.constant 0 : i32
    return %c0_i32, %c0_i32_0 : i32, i32
  }
  func.func @transform_6(%arg0: i32) -> (i32, i32) {
    %c0_i32 = arith.constant 0 : i32
    %c0_i32_0 = arith.constant 0 : i32
    %c0_i32_1 = arith.constant 0 : i32
    return %c0_i32, %c0_i32_0 : i32, i32
  }
  func.func @transform_7(%arg0: i32) -> (i32, i32) {
    %c0_i32 = arith.constant 0 : i32
    %c0_i32_0 = arith.constant 0 : i32
    %c0_i32_1 = arith.constant 0 : i32
    return %c0_i32, %c0_i32_0 : i32, i32
  }
  func.func @transform_8(%arg0: i32) -> (i32, i32) {
    %c0_i32 = arith.constant 0 : i32
    %c0_i32_0 = arith.constant 0 : i32
    %c0_i32_1 = arith.constant 0 : i32
    return %c0_i32, %c0_i32_0 : i32, i32
  }
}

</mosaic_0001>

<bundles_post_ra>
// kernel: tpu_custom_call.1
= control target key start
LH: loop header
LB: loop body
LE: loop exit
PB: predicated region body
PF: predicated region fallthrough
CT: control target
= control target key end

     0   :  { %14 = vsyncpa [#allocation3], 0  ;;  %vm30_vm0 = vcmask 261120   ;;  %s887_s0 = inlined_call_operand.vmem [shape: f32[8,32], index: 0, kind: input, shape index: {}]   ;;  %s888_s1 = inlined_call_operand.vmem [shape: f32[8,32], index: 1, kind: input, shape index: {}]   ;;  %s889_s2 = inlined_call_operand.vmem [shape: f32[32,32], index: 2, kind: input, shape index: {}]   ;;  %s890_s3 = inlined_call_operand.vmem [shape: f32[3,32], index: 3, kind: input, shape index: {}]   ;;  %s891_s4 = inlined_call_operand.vmem [shape: f32[32,16], index: 4, kind: input, shape index: {}]   ;;  %s892_s5 = inlined_call_operand.vmem [shape: f32[3,16], index: 5, kind: input, shape index: {}]   ;;  %s893_s6 = inlined_call_operand.hbm [shape: f32[16,32], index: 6, kind: output, shape index: {0}]   ;;  %s894_s7 = inlined_call_operand.hbm [shape: f32[16,16], index: 7, kind: output, shape index: {1}]   ;;  %s895_s8 = inlined_call_operand.hbm [shape: f32[16,16], index: 8, kind: output, shape index: {2}]  }
   0x1   :  { %v67_v0 = vld [vmem:[%s889_s2] sm:$0xff]  ;;  %v68_v1 = vld [vmem:[%s889_s2 + $0x8] sm:$0xff]  ;;  %v69_v2 = vld [vmem:[%s889_s2 + $0x10] sm:$0xff] }
   0x2   :  { %v568_v3 = vpack.c.bf16 %v68_v1, %v67_v0  ;;  %v70_v4 = vld [vmem:[%s889_s2 + $0x18] sm:$0xff]  ;;  %v28_v5 = vld [vmem:[%s887_s0] sm:$0xff] }
   0x3   :  { %v29_v6 = vld [vmem:[%s888_s1] sm:$0xff]  ;;  %v572_v7 = vpack.c.bf16 %v70_v4, %v69_v2  ;;  %31 = vst.msk [vmem:[#allocation2] sm:$0xff] %vm30_vm0, %v28_v5 }
   0x4   :  { %32 = vst.msk [vmem:[#allocation2 + $0x8] sm:$0xff] %vm30_vm0, %v29_v6 }
   0x5   :  { %15 = vsyncpa [#allocation5], 0  ;;  %569 = vmatprep.subr.bf16.mxu0 %v568_v3  ;;  %v74_v10 = vld [vmem:[%s891_s4] sm:$0xff]  ;;  %v75_v11 = vld [vmem:[%s891_s4 + $0x8] sm:$0xff]  ;;  %vm354_vm5 = vcmask 130048  }
   0x6   :  { %571 = vmatpush3.bf16.msra.mxu0 %v568_v3  ;;  %v576_v12 = vpack.c.bf16 %v75_v11, %v74_v10  ;;  %v76_v13 = vld [vmem:[%s891_s4 + $0x10] sm:$0xff]  ;;  %v77_v14 = vld [vmem:[%s891_s4 + $0x18] sm:$0xff]  ;;  %v524_v16 = vld [vmem:[%s890_s3] ss:$0 sm:$0xff] }
   0x7   :  { %573 = vmatprep.subr.bf16.mxu0 %v572_v7  ;;  %v580_v15 = vpack.c.bf16 %v77_v14, %v76_v13  ;;  %v527_v13 = vld [vmem:[%s890_s3 + $0x1] ss:$0 sm:$0xff] }
   0x8   :  { %577 = vmatprep.subr.bf16.mxu1 %v576_v12 }
   0x9   :  { %579 = vmatpush3.bf16.msra.mxu1 %v576_v12 }
   0xa   :  { %575 = vmatpush3.bf16.msra.mxu0 %v572_v7  ;;  %v765_v8 = vld [vmem:[#allocation2] sm:$0xff]  ;;  %581 = vmatprep.subr.bf16.mxu1 %v580_v15 }
   0xb   :  { %v767_v9 = vld [vmem:[#allocation2 + $0x8] sm:$0xff]  ;;  %554 = vmatprep.mubr.msk.f32.mxu0 %vm30_vm0, %v765_v8 }
   0xd   :  { %555 = vmatmul.mubr.msk.f32.vlgmr.msra.gmra.mrb[0].mxu0 %vm30_vm0, %v767_v9  ;;  %583 = vmatpush3.bf16.msra.mxu1 %v580_v15 }
  0xe0   :  { %v556_v17 = vpop.f32.mrb[0].mxu0 }
  0xe1   :  { %v162_v18 = vpop.f32.mrb[1].mxu0  ;;  %v168_v19 = vadd.f32 %v556_v17, %v524_v16 }
  0xe2   :  { %v163_v20 = vadd.f32 %v524_v16, %v162_v18  ;;  %v528_v16 = vld [vmem:[%s890_s3 + $0x2] ss:$0 sm:$0xff] }
  0xe3   :  { %v189_v24 = vsel %vm30_vm0, %v168_v19, 0.0 }
  0xe4   :  { %v177_v21 = vsub.f32 %v163_v20, %v163_v20  ;;  %v179_v22 = vsel %vm30_vm0, %v163_v20, 0.0 }
  0xe5   :  { %v182_v23 = vrot.slane %v179_v22, 4 }
  0xe6   :  { %v188_v25 = vsel %vm30_vm0, %v177_v21, 0.0 }
  0xe7   :  { %v183_v26 = vadd.f32 %v182_v23, %v179_v22  ;;  %v190_v27 = vadd.f32 %v189_v24, %v188_v25  ;;  %v35_v25 = vmul.f32 %v765_v8, %v765_v8 }
  0xe9   :  { %v184_v28 = vrot.slane %v183_v26, 2  ;;  %v191_v29 = vrot.slane %v190_v27, 4 }
  0xeb   :  { %v185_v30 = vadd.f32 %v184_v28, %v183_v26  ;;  %v192_v31 = vadd.f32 %v191_v29, %v190_v27  ;;  %v36_v26 = vmul.f32 %v767_v9, %v767_v9  ;;  %v37_v27 = vsel %vm30_vm0, %v35_v25, 0.0  ;;  %v529_v29 = vld [vmem:[%s892_s5] ss:$0 sm:$0xff] }
  0xec   :  { %38 = vadd.xlane.f32.xlu1 %v37_v27 }
  0xed   :  { %v186_v32 = vrot.slane %v185_v30, 1  ;;  %v193_v33 = vrot.slane %v192_v31, 2  ;;  %v40_v28 = vsel %vm30_vm0, %v36_v26, 0.0  ;;  %v532_v26 = vld [vmem:[%s892_s5 + $0x1] ss:$0 sm:$0xff] }
  0xef   :  { %v187_v34 = vadd.f32 %v186_v32, %v185_v30  ;;  %v194_v35 = vadd.f32 %v193_v33, %v192_v31 }
  0xf0   :  { %41 = vadd.xlane.f32.xlu1 %v40_v28 }
  0xf1   :  { %v199_v36 = vmul.f32 0.125, %v187_v34  ;;  %v195_v37 = vrot.slane %v194_v35, 1 }
  0xf3   :  { %v201_v38 = vsub.f32 %v163_v20, %v199_v36  ;;  %v196_v39 = vadd.f32 %v195_v37, %v194_v35 }
  0xf5   :  { %v203_v40 = vmul.f32 %v201_v38, %v201_v38  ;;  %v200_v41 = vmul.f32 0.125, %v196_v39 }
  0xf7   :  { %v207_v42 = vsel %vm30_vm0, %v203_v40, 0.0  ;;  %v216_v43 = vsub.f32 %v203_v40, %v203_v40  ;;  %v202_v44 = vsub.f32 %v168_v19, %v200_v41 }
  0xf8   :  { %v210_v45 = vrot.slane %v207_v42, 4 }
  0xf9   :  { %v204_v46 = vmul.f32 %v202_v44, %v202_v44  ;;  %v218_v48 = vsel %vm30_vm0, %v216_v43, 0.0 }
  0xfa   :  { %v211_v47 = vadd.f32 %v210_v45, %v207_v42 }
  0xfb   :  { %v219_v49 = vsel %vm30_vm0, %v204_v46, 0.0 }
  0xfc   :  { %v212_v50 = vrot.slane %v211_v47, 2  ;;  %v220_v51 = vadd.f32 %v219_v49, %v218_v48 }
  0xfe   :  { %v213_v52 = vadd.f32 %v212_v50, %v211_v47  ;;  %v221_v53 = vrot.slane %v220_v51, 4 }
 0x100   :  { %v214_v54 = vrot.slane %v213_v52, 1  ;;  %v222_v55 = vadd.f32 %v221_v53, %v220_v51 }
 0x102   :  { %v215_v56 = vadd.f32 %v214_v54, %v213_v52  ;;  %v223_v57 = vrot.slane %v222_v55, 2 }
 0x104   :  { %v229_v58 = vmul.f32 0.125, %v215_v56  ;;  %v224_v59 = vadd.f32 %v223_v57, %v222_v55 }
 0x106   :  { %v231_v60 = vadd.f32 1e-05, %v229_v58  ;;  %v225_v61 = vrot.slane %v224_v59, 1 }
 0x108   :  { %589 = vrsqrt.f32 %v231_v60  ;;  %v226_v62 = vadd.f32 %v225_v61, %v224_v59  ;;  %vm235_vm1 = vcmp.eq.f32.partialorder %v231_v60, inf  ;;  %v238_v3 = vand.u32 2147483648, %v231_v60 }
 0x109   :  { %vm237_vm2 = vcmp.eq.f32.partialorder %v231_v60, 0.0 }
 0x10a   :  { %v230_v63 = vmul.f32 0.125, %v226_v62 }
 0x10c   :  { %v232_v0 = vadd.f32 1e-05, %v230_v63 }
 0x10e   :  { %591 = vrsqrt.f32 %v232_v0  ;;  %vm242_vm3 = vcmp.eq.f32.partialorder %v232_v0, inf  ;;  %v245_v10 = vand.u32 2147483648, %v232_v0  ;;  %vm244_vm4 = vcmp.eq.f32.partialorder %v232_v0, 0.0 }
 0x112   :  { %v590_v1 = vpop.eup %589 }
 0x113   :  { %v234_v2 = vmul.f32 %v590_v1, %v231_v60 }
 0x115   :  { %v236_v4 = vsel %vm235_vm1, %v231_v60, %v234_v2 }
 0x116   :  { %v239_v5 = vsel %vm237_vm2, %v238_v3, %v236_v4 }
 0x117   :  { %593 = vrcp.f32 %v239_v5 }
 0x118   :  { %v592_v6 = vpop.eup %591 }
 0x119   :  { %v241_v7 = vmul.f32 %v592_v6, %v232_v0 }
 0x11b   :  { %v243_v11 = vsel %vm242_vm3, %v232_v0, %v241_v7 }
 0x11c   :  { %v246_v12 = vsel %vm244_vm4, %v245_v10, %v243_v11 }
 0x11d   :  { %595 = vrcp.f32 %v246_v12 }
 0x121   :  { %v594_v14 = vpop.eup %593 }
 0x122   :  { %v252_v15 = vmul.f32 %v594_v14, %v527_v13 }
 0x124   :  { %v255_v17 = vmul.f32 %v252_v15, %v201_v38 }
 0x126   :  { %v261_v18 = vadd.f32 %v528_v16, %v255_v17 }
 0x127   :  { %v596_v19 = vpop.eup %595 }
 0x128   :  { %v254_v20 = vmul.f32 %v596_v19, %v527_v13  ;;  %v263_v21 = vmax.f32 %v261_v18, 0.0 }
 0x12a   :  { %v256_v22 = vmul.f32 %v254_v20, %v202_v44  ;;  %565 = vmatprep.mubr.msk.f32.mxu1 %vm30_vm0, %v263_v21 }
 0x12c   :  { %v262_v23 = vadd.f32 %v528_v16, %v256_v22 }
 0x12e   :  { %v264_v24 = vmax.f32 %v262_v23, 0.0 }
 0x130   :  { %566 = vmatmul.mubr.msk.f32.vlgmr.msra.gmra.mrb[0].mxu1 %vm30_vm0, %v264_v24 }
 0x203   :  { %v567_v30 = vpop.f32.mrb[0].mxu1 }
 0x204   :  { %v341_v31 = vpop.f32.mrb[1].mxu1  ;;  %v347_v32 = vadd.f32 %v567_v30, %v529_v29 }
 0x205   :  { %v342_v33 = vadd.f32 %v529_v29, %v341_v31  ;;  %v533_v29 = vld [vmem:[%s892_s5 + $0x2] ss:$0 sm:$0xff]  ;;  %s695_s5 = smov [#allocation2]  }
 0x206   :  { %v365_v37 = vsel %vm354_vm5, %v347_v32, 0.0  ;;  %s482_s10 = sshll.u32 %s695_s5, 4  ;;  %s483_s10 = int_to_ptr.vmem [resolvable:$true] %s482_s10 }
 0x207   :  { %v352_v34 = vsub.f32 %v342_v33, %v342_v33  ;;  %v355_v35 = vsel %vm354_vm5, %v342_v33, 0.0  ;;  %s625_s11 = scalar_lea.vmem %s483_s10, 256  ;;  %p630_p1 = scmp.lt.s32.totalorder %s483_s10, %s483_s10 }
 0x208   :  { %v358_v36 = vrot.slane %v355_v35, 4  ;;  %p626_p0 = scmp.ne.s32.totalorder %s483_s10, %s625_s11  ;;  %p631_p2 = scmp.lt.s32.totalorder %s625_s11, %s625_s11 }
 0x209   :  { %v364_v38 = vsel %vm354_vm5, %v352_v34, 0.0 }
 0x20a   :  { %v359_v39 = vadd.f32 %v358_v36, %v355_v35  ;;  %v366_v40 = vadd.f32 %v365_v37, %v364_v38  ;;  %v39_v38 = vpop.xlane.xlu1 %38  ;;  %p632_p3 = por %p631_p2, %p630_p1 }
 0x20c   :  { %v360_v41 = vrot.slane %v359_v39, 2  ;;  %v367_v42 = vrot.slane %v366_v40, 4  ;;  %p633_p4 = pnand %p632_p3, %p626_p0 }
 0x20e   :  { %v361_v43 = vadd.f32 %v360_v41, %v359_v39  ;;  %v368_v44 = vadd.f32 %v367_v42, %v366_v40  ;;  %v43_v39 = vadd.f32 1e-12, %v39_v38  ;;  %v42_v40 = vpop.xlane.xlu1 %41 }
 0x20f   :  { %v44_v41 = vadd.f32 1e-12, %v42_v40 }
 0x210   :  { %v362_v45 = vrot.slane %v361_v43, 1  ;;  %v369_v46 = vrot.slane %v368_v44, 2  ;;  %vm47_vm10 = vcmp.eq.f32.partialorder %v43_v39, inf  ;;  %vm49_vm11 = vcmp.eq.f32.partialorder %v43_v39, 0.0 }
 0x211   :  { %vm54_vm12 = vcmp.eq.f32.partialorder %v44_v41, inf  ;;  %vm56_vm13 = vcmp.eq.f32.partialorder %v44_v41, 0.0 }
 0x212   :  { %v363_v47 = vadd.f32 %v362_v45, %v361_v43  ;;  %v370_v48 = vadd.f32 %v369_v46, %v368_v44 }
 0x214   :  { %v375_v49 = vmul.f32 0.125, %v363_v47  ;;  %v371_v50 = vrot.slane %v370_v48, 1 }
 0x216   :  { %v377_v51 = vsub.f32 %v342_v33, %v375_v49  ;;  %v372_v52 = vadd.f32 %v371_v50, %v370_v48 }
 0x218   :  { %v379_v53 = vmul.f32 %v377_v51, %v377_v51  ;;  %v376_v54 = vmul.f32 0.125, %v372_v52 }
 0x21a   :  { %v383_v55 = vsel %vm354_vm5, %v379_v53, 0.0  ;;  %v392_v56 = vsub.f32 %v379_v53, %v379_v53  ;;  %v378_v57 = vsub.f32 %v347_v32, %v376_v54 }
 0x21b   :  { %v386_v58 = vrot.slane %v383_v55, 4 }
 0x21c   :  { %v380_v59 = vmul.f32 %v378_v57, %v378_v57  ;;  %v394_v61 = vsel %vm354_vm5, %v392_v56, 0.0 }
 0x21d   :  { %v387_v60 = vadd.f32 %v386_v58, %v383_v55 }
 0x21e   :  { %v395_v62 = vsel %vm354_vm5, %v380_v59, 0.0 }
 0x21f   :  { %v388_v63 = vrot.slane %v387_v60, 2  ;;  %v396_v0 = vadd.f32 %v395_v62, %v394_v61 }
 0x221   :  { %v389_v1 = vadd.f32 %v388_v63, %v387_v60  ;;  %v397_v2 = vrot.slane %v396_v0, 4 }
 0x223   :  { %v390_v3 = vrot.slane %v389_v1, 1  ;;  %v398_v4 = vadd.f32 %v397_v2, %v396_v0 }
 0x225   :  { %v391_v5 = vadd.f32 %v390_v3, %v389_v1  ;;  %v399_v6 = vrot.slane %v398_v4, 2 }
 0x227   :  { %v405_v7 = vmul.f32 0.125, %v391_v5  ;;  %v400_v10 = vadd.f32 %v399_v6, %v398_v4 }
 0x229   :  { %v407_v11 = vadd.f32 1e-05, %v405_v7  ;;  %v401_v12 = vrot.slane %v400_v10, 1 }
 0x22b   :  { %597 = vrsqrt.f32 %v407_v11  ;;  %v402_v13 = vadd.f32 %v401_v12, %v400_v10  ;;  %vm411_vm6 = vcmp.eq.f32.partialorder %v407_v11, inf  ;;  %v414_v18 = vand.u32 2147483648, %v407_v11 }
 0x22c   :  { %vm413_vm7 = vcmp.eq.f32.partialorder %v407_v11, 0.0 }
 0x22d   :  { %v406_v14 = vmul.f32 0.125, %v402_v13 }
 0x22f   :  { %v408_v15 = vadd.f32 1e-05, %v406_v14 }
 0x231   :  { %599 = vrsqrt.f32 %v408_v15  ;;  %vm418_vm8 = vcmp.eq.f32.partialorder %v408_v15, inf  ;;  %v421_v23 = vand.u32 2147483648, %v408_v15  ;;  %vm420_vm9 = vcmp.eq.f32.partialorder %v408_v15, 0.0 }
 0x235   :  { %v598_v16 = vpop.eup %597 }
 0x236   :  { %v410_v17 = vmul.f32 %v598_v16, %v407_v11 }
 0x238   :  { %v412_v19 = vsel %vm411_vm6, %v407_v11, %v410_v17 }
 0x239   :  { %v415_v20 = vsel %vm413_vm7, %v414_v18, %v412_v19 }
 0x23a   :  { %601 = vrcp.f32 %v415_v20 }
 0x23b   :  { %v600_v21 = vpop.eup %599 }
 0x23c   :  { %v417_v22 = vmul.f32 %v600_v21, %v408_v15 }
 0x23e   :  { %v419_v24 = vsel %vm418_vm8, %v408_v15, %v417_v22 }
 0x23f   :  { %v422_v25 = vsel %vm420_vm9, %v421_v23, %v419_v24 }
 0x240   :  { %603 = vrcp.f32 %v422_v25 }
 0x241   :  { %605 = vrsqrt.f32 %v43_v39 }
 0x242   :  { %607 = vrsqrt.f32 %v44_v41 }
 0x244   :  { %v602_v27 = vpop.eup %601 }
 0x245   :  { %v428_v28 = vmul.f32 %v602_v27, %v532_v26 }
 0x247   :  { %v431_v30 = vmul.f32 %v428_v28, %v377_v51  ;;  %v50_v51 = vand.u32 2147483648, %v43_v39 }
 0x249   :  { %v437_v31 = vadd.f32 %v533_v29, %v431_v30 }
 0x24a   :  { %v604_v32 = vpop.eup %603 }
 0x24b   :  { %v439_v33 = vsel %vm354_vm5, %v437_v31, -inf  ;;  %v430_v34 = vmul.f32 %v604_v32, %v532_v26  ;;  %v606_v45 = vpop.eup %605 }
 0x24c   :  { %440 = vmax.xlane.f32.xlu0 %v439_v33  ;;  %v46_v49 = vmul.f32 %v606_v45, %v43_v39  ;;  %v608_v50 = vpop.eup %607 }
 0x24d   :  { %v432_v35 = vmul.f32 %v430_v34, %v378_v57  ;;  %v53_v53 = vmul.f32 %v608_v50, %v44_v41  ;;  %v57_v57 = vand.u32 2147483648, %v44_v41 }
 0x24e   :  { %v48_v52 = vsel %vm47_vm10, %v43_v39, %v46_v49 }
 0x24f   :  { %v438_v36 = vadd.f32 %v533_v29, %v432_v35  ;;  %v51_v56 = vsel %vm49_vm11, %v50_v51, %v48_v52  ;;  %v55_v58 = vsel %vm54_vm12, %v44_v41, %v53_v53 }
 0x250   :  { %v58_v59 = vsel %vm56_vm13, %v57_v57, %v55_v58 }
 0x251   :  { %v442_v37 = vsel %vm354_vm5, %v438_v36, -inf }
 0x252   :  { %443 = vmax.xlane.f32.xlu0 %v442_v37 }
 0x2d9   :  { %v441_v42 = vpop.xlane.xlu0 %440 }
 0x2da   :  { %v445_v43 = vsub.f32 %v437_v31, %v441_v42 }
 0x2dc   :  { %v447_v44 = vmul.f32 1.442695, %v445_v43 }
 0x2de   :  { %609 = vpow2.f32 %v447_v44 }
 0x2df   :  { %v444_v46 = vpop.xlane.xlu0 %443 }
 0x2e0   :  { %v446_v47 = vsub.f32 %v438_v36, %v444_v46 }
 0x2e2   :  { %v449_v48 = vmul.f32 1.442695, %v446_v47 }
 0x2e4   :  { %611 = vpow2.f32 %v449_v48 }
 0x2e5   :  { %613 = vrcp.f32 %v51_v56 }
 0x2e6   :  { %615 = vrcp.f32 %v58_v59 }
 0x2e8   :  { %v610_v54 = vpop.eup %609 }
 0x2e9   :  { %v451_v55 = vsel %vm354_vm5, %v610_v54, 0.0 }
 0x2ea   :  { %452 = vadd.xlane.f32.xlu0 %v451_v55 }
 0x2ee   :  { %v612_v60 = vpop.eup %611 }
 0x2ef   :  { %v454_v61 = vsel %vm354_vm5, %v612_v60, 0.0  ;;  %v614_v62 = vpop.eup %613 }
 0x2f0   :  { %455 = vadd.xlane.f32.xlu1 %v454_v61  ;;  %v63_v63 = vmul.f32 %v614_v62, %v765_v8  ;;  %v616_v0 = vpop.eup %615 }
 0x2f1   :  { %v64_v1 = vmul.f32 %v616_v0, %v767_v9 }
 0x2f2   :  { %65 = vst.msk [vmem:[#allocation2] sm:$0xff] %vm30_vm0, %v63_v63 }
 0x2f3   :  { %66 = vst.msk [vmem:[#allocation2 + $0x8] sm:$0xff] %vm30_vm0, %v64_v1 }
 0x2f4   :  { %636 = shalt.err (!%p633_p4)
}
 0x2f5   :  { %s637_s14 = scalar_lea.hbm %s893_s6, 256 }
 0x2f6   :  { %p638_p5 = scmp.ne.s32.totalorder %s893_s6, %s637_s14  ;;  %p641_p6 = scmp.lt.u32.totalorder %s637_s14, %s893_s6 }
 0x2f8   :  { %p643_p7 = pnand %p641_p6, %p638_p5 }
 0x2fa   :  { %646 = shalt.err (!%p643_p7)
}
 0x2fb   :  { %s696_s2 = smov 128   ;;  %s697_s17 = smov 8   ;;  %v465_v8 = vmax.f32 %v610_v54, 1e-37  ;;  %v466_v9 = vmax.f32 %v612_v60, 1e-37 }
 0x2fc   :  { %488 = dma.vmem_to_hbm [thread:$0]  %s483_s10, 256, %s893_s6, [#allocation3], %s696_s2, %s696_s2, %s697_s17  }
 0x2fd   :  { %617 = vrcp.f32 %v465_v8  ;;  %s698_s6 = smov [#allocation4]   ;;  %s699_s21 = smov [#allocation6]  }
 0x2fe   :  { %619 = vrcp.f32 %v466_v9  ;;  %s494_s20 = sshll.u32 %s698_s6, 4  ;;  %s506_s22 = sshll.u32 %s699_s21, 4  ;;  %s495_s20 = int_to_ptr.vmem [resolvable:$true] %s494_s20  ;;  %s849_s22 = int_to_ptr.vmem [resolvable:$true] %s506_s22 }
 0x2ff   :  { %s647_s23 = scalar_lea.vmem %s495_s20, 256  ;;  %p652_p9 = scmp.lt.s32.totalorder %s495_s20, %s495_s20 }
 0x300   :  { %p648_p8 = scmp.ne.s32.totalorder %s495_s20, %s647_s23  ;;  %p653_p10 = scmp.lt.s32.totalorder %s647_s23, %s647_s23 }
 0x302   :  { %p654_p11 = por %p653_p10, %p652_p9 }
 0x304   :  { %p655_p12 = pnand %p654_p11, %p648_p8 }
 0x307   :  { %v618_v2 = vpop.eup %617 }
 0x308   :  { %v620_v6 = vpop.eup %619 }
 0x377   :  { %v453_v3 = vpop.xlane.xlu0 %452 }
 0x378   :  { %621 = vrcp.f32 %v453_v3  ;;  %v471_v4 = vmul.f32 %v618_v2, %v453_v3 }
 0x37a   :  { %v473_v5 = vmin.f32 %v471_v4, 1e+30 }
 0x37c   :  { %475 = vst.msk [vmem:[#allocation6] sm:$0xff] %vm354_vm5, %v473_v5 }
 0x37d   :  { %v456_v7 = vpop.xlane.xlu1 %455 }
 0x37e   :  { %623 = vrcp.f32 %v456_v7  ;;  %v472_v10 = vmul.f32 %v620_v6, %v456_v7 }
 0x380   :  { %v474_v11 = vmin.f32 %v472_v10, 1e+30 }
 0x382   :  { %v622_v12 = vpop.eup %621  ;;  %476 = vst.msk [vmem:[#allocation6 + $0x8] sm:$0xff] %vm354_vm5, %v474_v11 }
 0x383   :  { %v461_v13 = vmul.f32 %v622_v12, %v610_v54 }
 0x385   :  { %463 = vst.msk [vmem:[#allocation4] sm:$0xff] %vm354_vm5, %v461_v13 }
 0x388   :  { %v624_v14 = vpop.eup %623 }
 0x389   :  { %v462_v15 = vmul.f32 %v624_v14, %v612_v60 }
 0x38b   :  { %464 = vst.msk [vmem:[#allocation4 + $0x8] sm:$0xff] %vm354_vm5, %v462_v15 }
 0x38c   :  { %658 = shalt.err (!%p655_p12)
}
 0x38d   :  { %s659_s25 = scalar_lea.hbm %s894_s7, 256 }
 0x38e   :  { %p660_p13 = scmp.ne.s32.totalorder %s894_s7, %s659_s25  ;;  %p663_p0 = scmp.lt.u32.totalorder %s659_s25, %s894_s7 }
 0x390   :  { %p665_p1 = pnand %p663_p0, %p660_p13 }
 0x392   :  { %668 = shalt.err (!%p665_p1)
}
 0x393   :  { %500 = dma.vmem_to_hbm [thread:$0]  %s495_s20, 256, %s894_s7, [#allocation5], %s696_s2, %s696_s2, %s697_s17  }
 0x394   :  { %s669_s9 = scalar_lea.vmem %s849_s22, 256  ;;  %p674_p3 = scmp.lt.s32.totalorder %s849_s22, %s849_s22 }
 0x395   :  { %p670_p2 = scmp.ne.s32.totalorder %s849_s22, %s669_s9  ;;  %p675_p4 = scmp.lt.s32.totalorder %s669_s9, %s669_s9 }
 0x397   :  { %p676_p5 = por %p675_p4, %p674_p3 }
 0x399   :  { %p677_p6 = pnand %p676_p5, %p670_p2 }
 0x39b   :  { %680 = shalt.err (!%p677_p6)
}
 0x39c   :  { %s681_s11 = scalar_lea.hbm %s895_s8, 256 }
 0x39d   :  { %p682_p7 = scmp.ne.s32.totalorder %s895_s8, %s681_s11  ;;  %p685_p8 = scmp.lt.u32.totalorder %s681_s11, %s895_s8 }
 0x39f   :  { %p687_p9 = pnand %p685_p8, %p682_p7 }
 0x3a1   :  { %690 = shalt.err (!%p687_p9)
}
 0x3a2   :  { %512 = dma.vmem_to_hbm [thread:$0]  %s849_s22, 256, %s895_s8, [#allocation5], %s696_s2, %s696_s2, %s697_s17  }
 0x3a3   :  { %691 = dma.done.wait [#allocation3], 256  }
 0x3a4   :  { %692 = vsyncadd [#allocation3], 4294967040 }
 0x3a5   :  { %693 = dma.done.wait [#allocation5], 512  }
 0x3a6   :  { %694 = vsyncadd [#allocation5], 4294966784 }
 0x3a7   :  { %522 = vsyncpa [#allocation3], 1 }
 0x3a8   :  { %523 = vsyncpa [#allocation5], 1 }

</bundles_post_ra>
